<compile_context>
chip_gen: v6e
topology: v6e:2x2x1
jax: 0.10.0
libtpu: 0.0.40
codegen_flags: <defaults>
</compile_context>

<pallas_src>
import functools

import jax
import jax.numpy as jnp
from jax.experimental import pallas as pl
from jax.experimental.pallas import tpu as pltpu


def _round_up(x, m):
    return (x + m - 1) // m * m


def _vmem_capacity_bytes():
    # Generation-aware VMEM budget (v5e/v6e: 128 MiB, v7x: 64 MiB per TC).
    try:
        cap = int(getattr(pltpu.get_tpu_info(), "vmem_capacity_bytes", 0))
        if cap > 0:
            return cap
    except Exception:
        pass
    return 64 << 20  # conservative default (v7x per-TC)


def _choose_channel_tile(c):
    """Full C unless it is wide (>512) and splits cleanly into 128-multiples."""
    if c % 128 == 0 and c > 512:
        for cand in (512, 384, 256, 128):
            if c % cand == 0:
                return cand
    return c


def _choose_point_tile(n, row_bytes, bp, block_budget):
    """Largest 128-multiple point tile fitting the VMEM + one-hot budgets."""
    onehot_budget = 2 << 20                      # bp * tn * 4 bytes cap
    cap_rows = min(block_budget // max(row_bytes, 1),
                   onehot_budget // max(bp * 4, 1))
    cap_rows = max(128, cap_rows // 128 * 128)
    if n <= cap_rows:
        return n                                 # single tile: full-dim block is legal
    tn = cap_rows
    if n % tn != 0:
        # Prefer a 128-multiple tile that divides N so the ragged mask path
        # (a full VPU select over the streamed data) compiles away.
        for cand in range(cap_rows, max(cap_rows // 2, 0), -128):
            if n % cand == 0:
                return cand
    return tn


def _segment_sum_kernel(bidx_ref, feat_ref, out_ref, acc_ref, *,
                        num_points, tile_n, ragged):
    k = pl.program_id(2)                          # point-tile index (reduction axis)

    @pl.when(k == 0)
    def _init():                                  # fresh accumulator per (shard, c-block)
        acc_ref[...] = jnp.zeros_like(acc_ref)

    feats = feat_ref[...]                         # (TN, Cw), native dtype (no upcast)
    bidx = bidx_ref[...]                          # (1, TN) int32, lane-dense along N
    tn, cw = feats.shape
    bp = acc_ref.shape[0]

    if ragged:
        # Only the true last tile is partial; stale VMEM rows (possibly NaN)
        # must be zeroed out of both the streamed features and the mask.
        start = (pl.program_id(0) * pl.num_programs(2) + k) * tile_n
        row_ids = start + jax.lax.broadcasted_iota(jnp.int32, (tn, 1), 0)
        lane_ids = start + jax.lax.broadcasted_iota(jnp.int32, (1, tn), 1)
        feats = jnp.where(row_ids < num_points, feats, 0)
        valid = lane_ids < num_points             # (1, TN)

    # One-hot membership (Bp, TN): sublane iota vs sublane-broadcast bidx.
    # Pure VPU compare, no lane<->sublane transpose.
    b_ids = jax.lax.broadcasted_iota(jnp.int32, (bp, tn), 0)
    onehot = b_ids == jnp.broadcast_to(bidx, (bp, tn))
    if ragged:
        onehot = jnp.logical_and(onehot, jnp.broadcast_to(valid, (bp, tn)))

    # Segment sum on the MXU; f32 accumulate.
    acc_ref[...] += jnp.dot(onehot.astype(feats.dtype), feats,
                            preferred_element_type=jnp.float32)

    @pl.when(k == pl.num_programs(2) - 1)
    def _finalize():
        res = acc_ref[...]                        # (Bp, Cw) f32 partial sums
        pad = out_ref.shape[-1] - cw
        if pad:                                   # lane-pad to the 128-wide output slab
            res = jnp.concatenate(
                [res, jnp.zeros((bp, pad), jnp.float32)], axis=1)
        out_ref[0] = res


def global_avg_pool(feats, batch_idx, num_batches):
    """feats: [N, C], batch_idx: [N] int -> [B, C] per-batch feature mean."""
    n, c = feats.shape
    itemsize = jnp.dtype(feats.dtype).itemsize

    bp = _round_up(num_batches, 8)                # sublane-pad batch axis
    cp = _round_up(c, 128)                        # lane-pad channel axis

    # ---- channel tiling -------------------------------------------------
    tc_in = _choose_channel_tile(c)               # streamed feats channel width
    grid_c = c // tc_in                           # == 1 unless C>512 & splittable
    tc_out = tc_in if grid_c > 1 else cp          # output block lane width

    # ---- point tiling (VMEM-budgeted, generation-aware) -----------------
    vmem_cap = _vmem_capacity_bytes()
    block_budget = (8 << 20) if vmem_cap >= (96 << 20) else (4 << 20)
    tn = _choose_point_tile(n, tc_in * itemsize, bp, block_budget)
    grid_n = -(-n // tn)
    ragged = (grid_n * tn) != n

    # ---- v7x two-TensorCore split: shard the point tiles -----------------
    # Partial sums per shard; combined in the wrapper.  No-op cost on 1-TC chips.
    num_shards = 2 if (grid_n >= 2 and grid_n % 2 == 0) else 1
    grid_n_shard = grid_n // num_shards

    bidx2d = batch_idx.reshape(1, n).astype(jnp.int32)   # lane-dense along N

    kernel = functools.partial(_segment_sum_kernel,
                               num_points=n, tile_n=tn, ragged=ragged)

    vmem_limit = max(32 << 20, min(vmem_cap * 3 // 4, 96 << 20))

    cost = pl.CostEstimate(
        flops=2 * bp * n * c,
        transcendentals=0,
        bytes_accessed=n * c * itemsize + grid_c * n * 4
        + num_shards * bp * cp * 4,
    )

    partial_sums = pl.pallas_call(
        kernel,
        out_shape=jax.ShapeDtypeStruct((num_shards, bp, cp), jnp.float32),
        grid_spec=pltpu.PrefetchScalarGridSpec(
            num_scalar_prefetch=0,
            grid=(num_shards, grid_c, grid_n_shard),   # reduction (points) axis last
            in_specs=[
                pl.BlockSpec((1, tn),
                             lambda s, ci, k: (0, s * grid_n_shard + k)),
                pl.BlockSpec((tn, tc_in),
                             lambda s, ci, k: (s * grid_n_shard + k, ci)),
            ],
            out_specs=pl.BlockSpec((1, bp, tc_out),
                                   lambda s, ci, k: (s, 0, ci)),
            scratch_shapes=[
                pltpu.VMEM((bp, tc_in), jnp.float32),  # running segment sums
            ],
        ),
        compiler_params=pltpu.CompilerParams(
            dimension_semantics=("parallel", "parallel", "arbitrary"),
            vmem_limit_bytes=int(vmem_limit),
        ),
        cost_estimate=cost,
    )(bidx2d, feats)

    # Tiny [B, C] epilogue in plain JAX: combine shards, exact int32 counts,
    # divide, cast.  Negligible next to the N*C feature stream.
    sums = partial_sums.sum(axis=0)[:num_batches, :c]
    counts = jnp.zeros((num_batches,), jnp.int32).at[batch_idx].add(1)
    inv = 1.0 / jnp.maximum(counts, 1).astype(jnp.float32)
    return (sums * inv[:, None]).astype(feats.dtype)


if __name__ == "__main__":
    key = jax.random.PRNGKey(0)
    k_feat, k_batch = jax.random.split(key)

    # Small synthetic "sparse tensor": 64 points, 32 channels, 2 batch items.
    N, C, B = 64, 32, 2
    feats = jax.random.normal(k_feat, (N, C), dtype=jnp.float32)
    batch_idx = jax.random.randint(k_batch, (N,), 0, B, dtype=jnp.int32)

    out = global_avg_pool(feats, batch_idx, B)
    out = jax.block_until_ready(out)

    # Reference: plain-JAX segment mean.
    one_hot = (batch_idx[None, :] == jnp.arange(B)[:, None]).astype(jnp.float32)
    ref_sums = one_hot @ feats
    ref_counts = jnp.maximum(one_hot.sum(axis=1, keepdims=True), 1.0)
    ref = ref_sums / ref_counts

    assert out.shape == (B, C)
    assert jnp.allclose(out, ref, atol=1e-5, rtol=1e-5)
    print("KERNEL_OK")
</pallas_src>

<mosaic_0001>
module attributes {stable_mosaic.version = 11 : i64} {
  func.func @_segment_sum_kernel(%arg0: i32, %arg1: i32, %arg2: i32, %arg3: memref<1x64xi32, #tpu.memory_space<vmem>>, %arg4: memref<64x32xf32, #tpu.memory_space<vmem>>, %arg5: memref<1x8x128xf32, #tpu.memory_space<vmem>>, %arg6: memref<8x32xf32, #tpu.memory_space<vmem>>) attributes {dimension_semantics = [#tpu.dimension_semantics<parallel>, #tpu.dimension_semantics<parallel>, #tpu.dimension_semantics<arbitrary>], iteration_bounds = array<i64: 1, 1, 1>, scalar_prefetch = 0 : i64, scratch_operands = 1 : i64, tpu.core_type = #tpu.core_type<tc>, window_params = [{transform_indices = @transform_0, window_bounds = array<i64: 1, 64>}, {transform_indices = @transform_1, window_bounds = array<i64: 64, 32>}, {transform_indices = @transform_2, window_bounds = array<i64: 1, 8, 128>}]} {
    %c0_i32 = arith.constant 0 : i32
    %0 = arith.cmpi eq, %arg2, %c0_i32 : i32
    %1 = arith.extui %0 : i1 to i32
    %c0_i32_0 = arith.constant 0 : i32
    %2 = arith.cmpi ne, %1, %c0_i32_0 : i32
    scf.if %2 {
      %cst_10 = arith.constant 0.000000e+00 : f32
      %18 = vector.broadcast %cst_10 : f32 to vector<8x32xf32>
      %c0_11 = arith.constant 0 : index
      %c0_12 = arith.constant 0 : index
      %19 = vector.load %arg6[%c0_11, %c0_12] : memref<8x32xf32, #tpu.memory_space<vmem>>, vector<8x32xf32>
      tpu.vector_store %arg6[%c0_11, %c0_12], %18 {strides = array<i32>} : memref<8x32xf32, #tpu.memory_space<vmem>>, vector<8x32xf32>,
    } else {
    }
    %c0 = arith.constant 0 : index
    %c0_1 = arith.constant 0 : index
    %3 = vector.load %arg4[%c0, %c0_1] : memref<64x32xf32, #tpu.memory_space<vmem>>, vector<64x32xf32>
    %c0_2 = arith.constant 0 : index
    %c0_3 = arith.constant 0 : index
    %4 = vector.load %arg3[%c0_2, %c0_3] : memref<1x64xi32, #tpu.memory_space<vmem>>, vector<1x64xi32>
    %5 = tpu.iota {dimensions = array<i32: 0>} : vector<8x64xi32>
    %6 = vector.shape_cast %4 : vector<1x64xi32> to vector<1x64xi32>
    %7 = vector.broadcast %6 : vector<1x64xi32> to vector<8x64xi32>
    %8 = arith.cmpi eq, %5, %7 : vector<8x64xi32>
    %c0_4 = arith.constant 0 : index
    %c0_5 = arith.constant 0 : index
    %9 = vector.load %arg6[%c0_4, %c0_5] : memref<8x32xf32, #tpu.memory_space<vmem>>, vector<8x32xf32>
    %10 = arith.extui %8 : vector<8x64xi1> to vector<8x64xi32>
    %11 = arith.sitofp %10 : vector<8x64xi32> to vector<8x64xf32>
    %cst = arith.constant dense<0.000000e+00> : vector<8x32xf32>
    %12 = tpu.matmul %11, %3, %cst {dimension_numbers = #tpu.dot_dimension_numbers<[1], [0], [0], [1], [0, 0, 1, 1], [], []>} : vector<8x64xf32>, vector<64x32xf32>, vector<8x32xf32> -> vector<8x32xf32>
    %13 = arith.addf %9, %12 : vector<8x32xf32>
    %c0_6 = arith.constant 0 : index
    %c0_7 = arith.constant 0 : index
    %14 = vector.load %arg6[%c0_6, %c0_7] : memref<8x32xf32, #tpu.memory_space<vmem>>, vector<8x32xf32>
    tpu.vector_store %arg6[%c0_6, %c0_7], %13 {strides = array<i32>} : memref<8x32xf32, #tpu.memory_space<vmem>>, vector<8x32xf32>,
    %c0_i32_8 = arith.constant 0 : i32
    %15 = arith.cmpi eq, %arg2, %c0_i32_8 : i32
    %16 = arith.extui %15 : i1 to i32
    %c0_i32_9 = arith.constant 0 : i32
    %17 = arith.cmpi ne, %16, %c0_i32_9 : i32
    scf.if %17 {
      %c0_10 = arith.constant 0 : index
      %c0_11 = arith.constant 0 : index
      %18 = vector.load %arg6[%c0_10, %c0_11] : memref<8x32xf32, #tpu.memory_space<vmem>>, vector<8x32xf32>
      %cst_12 = arith.constant 0.000000e+00 : f32
      %19 = vector.broadcast %cst_12 : f32 to vector<8x96xf32>
      %20 = tpu.concatenate %18, %19 in 1 : vector<8x32xf32>, vector<8x96xf32> -> vector<8x128xf32>
      %c0_13 = arith.constant 0 : index
      %c0_14 = arith.constant 0 : index
      %c0_15 = arith.constant 0 : index
      %21 = vector.load %arg5[%c0_13, %c0_14, %c0_15] : memref<1x8x128xf32, #tpu.memory_space<vmem>>, vector<1x8x128xf32>
      %22 = vector.shape_cast %21 : vector<1x8x128xf32> to vector<8x128xf32>
      %23 = vector.shape_cast %20 : vector<8x128xf32> to vector<1x8x128xf32>
      tpu.vector_store %arg5[%c0_13, %c0_14, %c0_15], %23 {strides = array<i32>} : memref<1x8x128xf32, #tpu.memory_space<vmem>>, vector<1x8x128xf32>,
    } else {
    }
    return
  }
  func.func @transform_0(%arg0: i32, %arg1: i32, %arg2: i32) -> (i32, i32) {
    %c1_i32 = arith.constant 1 : i32
    %0 = arith.muli %arg0, %c1_i32 : i32
    %1 = arith.addi %0, %arg2 : i32
    %c0_i32 = arith.constant 0 : i32
    %c0_i32_0 = arith.constant 0 : i32
    return %c0_i32, %1 : i32, i32
  }
  func.func @transform_1(%arg0: i32, %arg1: i32, %arg2: i32) -> (i32, i32) {
    %c1_i32 = arith.constant 1 : i32
    %0 = arith.muli %arg0, %c1_i32 : i32
    %1 = arith.addi %0, %arg2 : i32
    %c0_i32 = arith.constant 0 : i32
    return %1, %arg1 : i32, i32
  }
  func.func @transform_2(%arg0: i32, %arg1: i32, %arg2: i32) -> (i32, i32, i32) {
    %c0_i32 = arith.constant 0 : i32
    %c0_i32_0 = arith.constant 0 : i32
    return %arg0, %c0_i32, %arg1 : i32, i32, i32
  }
}

</mosaic_0001>

<bundles_post_ra>
// kernel: tpu_custom_call.1
= control target key start
LH: loop header
LB: loop body
LE: loop exit
PB: predicated region body
PF: predicated region fallthrough
CT: control target
= control target key end

     0   :  { %v235_v1 = vmov 0.0   ;;  %vm236_vm0 = vmmov 0   ;;  %vm52_vm1 = vcmask 261120   ;;  %v63_v4 = vlaneseq  ;;  %s286_s0 = inlined_call_operand.vmem [shape: s32[1,64], index: 0, kind: input, shape index: {}]   ;;  %s287_s1 = inlined_call_operand.vmem [shape: f32[64,32], index: 1, kind: input, shape index: {}]   ;;  %s288_s2 = inlined_call_operand.hbm [shape: f32[1,8,128], index: 2, kind: output, shape index: {}]  }
   0x1   :  { %v61_v0 = vld [vmem:[%s287_s1 + $0x38] sm:$0xff]  ;;  %191 = vmatprep.subr.mxu0 %v235_v1  ;;  %v60_v2 = vld [vmem:[%s287_s1 + $0x30] sm:$0xff]  ;;  %207 = vmatprep.mubr.msk.f32.mxu0 %vm236_vm0, %v235_v1  ;;  %53 = vst.msk [vmem:[#allocation2] sm:$0xff] %vm52_vm1, %v235_v1  ;;  %v59_v3 = vld [vmem:[%s287_s1 + $0x28] sm:$0xff] }
   0x2   :  { %192 = vmatpush3.msra.mxu0 %v61_v0 }
   0x3   :  { %193 = vmatprep.subr.mxu0 %v235_v1 }
   0x4   :  { %7 = vsyncpa [#allocation4], 0  ;;  %194 = vmatpush3.msra.mxu0 %v60_v2  ;;  %v58_v5 = vld [vmem:[%s287_s1 + $0x20] sm:$0xff]  ;;  %v57_v6 = vld [vmem:[%s287_s1 + $0x18] sm:$0xff]  ;;  %v64_v7 = vshrl.u32 %v63_v4, 7  ;;  %vm73_vm3 = vcmask 523264  }
   0x5   :  { %195 = vmatprep.subr.mxu0 %v235_v1  ;;  %v179_v8 = vld [vmem:[%s286_s0] ss:$0 sm:$0xff]  ;;  %v56_v9 = vld [vmem:[%s287_s1 + $0x10] sm:$0xff]  ;;  %v55_v10 = vld [vmem:[%s287_s1 + $0x8] sm:$0xff]  ;;  %s237_s0 = smov [#allocation3]  }
   0x6   :  { %196 = vmatpush3.msra.mxu0 %v59_v3  ;;  %vm69_vm2 = vcmp.eq.s32.totalorder %v64_v7, %v179_v8  ;;  %v54_v11 = vld [vmem:[%s287_s1] sm:$0xff]  ;;  %s162_s27 = sshll.u32 %s237_s0, 4  ;;  %s163_s27 = int_to_ptr.vmem [resolvable:$true] %s162_s27 }
   0x7   :  { %197 = vmatprep.subr.mxu0 %v235_v1  ;;  %v180_v12 = vsel %vm69_vm2, 1.0, %v235_v1  ;;  %s213_s1 = scalar_lea.vmem %s163_s27, 128  ;;  %p218_p1 = scmp.lt.s32.totalorder %s163_s27, %s163_s27 }
   0x8   :  { %198 = vmatpush3.msra.mxu0 %v58_v5  ;;  %v70_v13 = vld [vmem:[#allocation2] sm:$0xff]  ;;  %p214_p0 = scmp.ne.s32.totalorder %s163_s27, %s213_s1  ;;  %p219_p2 = scmp.lt.s32.totalorder %s213_s1, %s213_s1 }
   0x9   :  { %199 = vmatprep.subr.mxu0 %v235_v1 }
   0xa   :  { %200 = vmatpush3.msra.mxu0 %v57_v6  ;;  %p220_p3 = por %p219_p2, %p218_p1 }
   0xb   :  { %201 = vmatprep.subr.mxu0 %v235_v1 }
   0xc   :  { %202 = vmatpush3.msra.mxu0 %v56_v9  ;;  %p221_p4 = pnand %p220_p3, %p214_p0 }
   0xd   :  { %203 = vmatprep.subr.mxu0 %v235_v1 }
   0xe   :  { %204 = vmatpush3.msra.mxu0 %v55_v10 }
   0xf   :  { %205 = vmatprep.subr.mxu0 %v235_v1 }
  0x10   :  { %206 = vmatpush3.msra.mxu0 %v54_v11 }
  0x11   :  { %208 = vmatmul.mubr.msk.f32.vlgmr.msra.gmra.mxu0 %vm73_vm3, %v180_v12 }
  0xd1   :  { %v143_v14 = vpop.f32.mrf.mxu0 }
  0xd2   :  { %v147_v15 = vadd.f32 %v143_v14, %v70_v13 }
  0xd3   :  { %v209_v16 = vpop.f32.mrf.mxu0 }
  0xd4   :  { %149 = vst.msk [vmem:[#allocation2] sm:$0xff] %vm52_vm1, %v147_v15 }
  0xdb   :  { %v153_v17 = vld [vmem:[#allocation2] sm:$0xff] }
  0xdc   :  { %v154_v18 = vsel %vm52_vm1, %v153_v17, 0.0 }
  0xdd   :  { %155 = vst [vmem:[#allocation3] sm:$0xff] %v154_v18 }
  0xde   :  { %224 = shalt.err (!%p221_p4)
}
  0xdf   :  { %165 = dma.vmem_to_hbm [thread:$0]  %s163_s27, 128, %s288_s2, [#allocation4]  }
  0xe0   :  { %233 = dma.done.wait [#allocation4], 128  }
  0xe1   :  { %234 = vsyncadd [#allocation4], 4294967168 }
  0xe2   :  { %169 = vsyncpa [#allocation4], 1 }

</bundles_post_ra>
